<compile_context>
chip_gen: v7x
topology: tpu7x:2x2x1
jax: 0.10.0
libtpu: 0.0.40
codegen_flags: <defaults>
</compile_context>

<pallas_src>
import functools
import math

import jax
import jax.numpy as jnp
import numpy as np
from jax.experimental import pallas as pl
from jax.experimental.pallas import tpu as pltpu


# ---------------------------------------------------------------------------
# Nearest-neighbour indexing helpers (PyTorch semantics: src = dst*in // out).
# ---------------------------------------------------------------------------
def _nearest_index(out_size: int, in_size: int) -> np.ndarray:
    dst = np.arange(out_size)
    src = (dst * in_size) // out_size
    return np.minimum(src, in_size - 1)


def _col_selection_matrix(w_out: int, w_in: int) -> np.ndarray:
    # base[i, j] = 1 iff input column i is the nearest source of output col j.
    idx = _nearest_index(w_out, w_in)
    base = np.zeros((w_in, w_out), dtype=np.float32)
    base[idx, np.arange(w_out)] = 1.0
    return base


def _round_up(a: int, b: int) -> int:
    return -(-a // b) * b


# ---------------------------------------------------------------------------
# Fast path: integer upscale factors in both H and W.
# ---------------------------------------------------------------------------
def _upsample_int_kernel(x_ref, ct_ref, o_ref):
    # x_ref : (TM, W_in)            TM = planes_per_step * H_in
    # ct_ref: (W_in, s_h * W_out)   fused 0/1 column-selection + row-repeat
    # o_ref : (TM, s_h * W_out)
    y = jnp.dot(x_ref[...].astype(ct_ref.dtype), ct_ref[...],
                preferred_element_type=jnp.float32)
    o_ref[...] = y.astype(o_ref.dtype)


def _pick_block_planes(nc, h_in, per_plane_bytes, itemsize):
    """Largest divisor of nc whose per-step tile fits the VMEM budget."""
    budget = 8 * 1024 * 1024                       # single-buffer budget/step
    sublane = {4: 8, 2: 16, 1: 32}.get(itemsize, 8)
    divisors = [d for d in range(1, nc + 1) if nc % d == 0]

    def aligned(d):                                # (8,128) rule on row dim
        return d == nc or (d * h_in) % sublane == 0

    ok = [d for d in divisors if aligned(d)]
    fits = [d for d in ok if d * per_plane_bytes <= budget]
    tc = max(fits) if fits else min(ok)
    # Prefer >=2 grid steps (v7x: two TensorCores fed via the parallel axis),
    # but only if tiles stay >= 512 KiB.
    if nc // tc < 2:
        multi = [d for d in fits
                 if nc // d >= 2 and d * per_plane_bytes >= 512 * 1024]
        if multi:
            tc = max(multi)
    return tc


def _upsample_int(x, h_out, w_out):
    n, c, h_in, w_in = x.shape
    nc = n * c
    sh = h_out // h_in
    itemsize = x.dtype.itemsize

    # bf16 stays on the native bf16 MXU path; everything else computes in f32.
    compute_dtype = (x.dtype
                     if x.dtype in (jnp.dtype(jnp.bfloat16), jnp.dtype(jnp.float32))
                     else jnp.dtype(jnp.float32))

    # Fused selection matrix: one matmul does the W nearest gather and the
    # s_h-fold row repeat (repeat lands in the lane dim, so the reshape back
    # to NCHW outside the kernel is a free contiguous reshape).
    # TODO(synk): for very large W_out the (W_in, s_h*W_out) matrix could be
    # tiled over an extra grid axis instead of living fully in VMEM.
    ct_np = np.tile(_col_selection_matrix(w_out, w_in), (1, sh))
    ct = jnp.asarray(ct_np, dtype=compute_dtype)

    out_w = sh * w_out
    per_plane = (itemsize * h_in * _round_up(w_in, 128)       # input tile
                 + itemsize * h_in * _round_up(out_w, 128)    # output tile
                 + 4 * h_in * _round_up(out_w, 128))          # f32 matmul result
    tc = _pick_block_planes(nc, h_in, per_plane, itemsize)
    grid = (nc // tc,)
    tm = tc * h_in

    ct_bytes = jnp.dtype(compute_dtype).itemsize * w_in * _round_up(out_w, 128)
    vmem_limit = int(min(max(32 << 20,
                             2 * tc * per_plane + ct_bytes + (4 << 20)),
                         112 << 20))

    x2 = x.reshape(nc * h_in, w_in)
    out2 = pl.pallas_call(
        _upsample_int_kernel,
        out_shape=jax.ShapeDtypeStruct((nc * h_in, out_w), x.dtype),
        grid_spec=pltpu.PrefetchScalarGridSpec(
            num_scalar_prefetch=0,
            grid=grid,
            in_specs=[
                pl.BlockSpec((tm, w_in), lambda i: (i, 0)),
                pl.BlockSpec((w_in, out_w), lambda i: (0, 0)),
            ],
            out_specs=pl.BlockSpec((tm, out_w), lambda i: (i, 0)),
        ),
        compiler_params=pltpu.CompilerParams(
            dimension_semantics=("parallel",),
            vmem_limit_bytes=vmem_limit,
        ),
    )(x2, ct)

    # (nc*h_in, sh*w_out) already has the NCHW element order -> free reshape.
    return out2.reshape(n, c, h_out, w_out)


# ---------------------------------------------------------------------------
# General path: arbitrary (non-integer-ratio) sizes, incl. downsampling.
# ---------------------------------------------------------------------------
def _upsample_general_kernel(x_ref, r_ref, ct_ref, o_ref):
    # x_ref: (1, H_in, W_in), r_ref: (H_out, H_in), ct_ref: (W_in, W_out)
    x = x_ref[0].astype(jnp.float32)
    tmp = jnp.dot(r_ref[...], x, preferred_element_type=jnp.float32)
    out = jnp.dot(tmp, ct_ref[...], preferred_element_type=jnp.float32)
    o_ref[0] = out.astype(o_ref.dtype)


def _upsample_general(x, h_out, w_out):
    # TODO(synk): fallback uses per-plane 0/1 selection matmuls; correct for
    # finite inputs but NaN/Inf in a source row/col contaminates the output
    # row (unlike a pure gather/copy).
    n, c, h_in, w_in = x.shape
    h_idx = _nearest_index(h_out, h_in)
    r_np = np.zeros((h_out, h_in), dtype=np.float32)
    r_np[np.arange(h_out), h_idx] = 1.0
    r = jnp.asarray(r_np)
    ct = jnp.asarray(_col_selection_matrix(w_out, w_in))

    x_flat = x.reshape(n * c, h_in, w_in)
    out_flat = pl.pallas_call(
        _upsample_general_kernel,
        out_shape=jax.ShapeDtypeStruct((n * c, h_out, w_out), x.dtype),
        grid_spec=pltpu.PrefetchScalarGridSpec(
            num_scalar_prefetch=0,
            grid=(n * c,),
            in_specs=[
                pl.BlockSpec((1, h_in, w_in), lambda i: (i, 0, 0)),
                pl.BlockSpec((h_out, h_in), lambda i: (0, 0)),
                pl.BlockSpec((w_in, w_out), lambda i: (0, 0)),
            ],
            out_specs=pl.BlockSpec((1, h_out, w_out), lambda i: (i, 0, 0)),
        ),
        compiler_params=pltpu.CompilerParams(
            dimension_semantics=("parallel",),
        ),
    )(x_flat, r, ct)
    return out_flat.reshape(n, c, h_out, w_out)


# ---------------------------------------------------------------------------
# Public entry point / module wrapper.
# ---------------------------------------------------------------------------
@functools.partial(jax.jit, static_argnames=("size", "scale_factor", "mode"))
def interpolate_pallas(x, *, size=None, scale_factor=None, mode="nearest"):
    # TODO(synk): only mode='nearest' (the module's default) is implemented.
    assert mode == "nearest", "only mode='nearest' is implemented"
    _, _, h_in, w_in = x.shape
    if size is not None:
        if isinstance(size, int):
            h_out = w_out = int(size)
        else:
            h_out, w_out = int(size[0]), int(size[1])
    else:
        assert scale_factor is not None, "need size or scale_factor"
        if isinstance(scale_factor, (int, float)):
            sf_h = sf_w = scale_factor
        else:
            sf_h, sf_w = scale_factor
        h_out = int(math.floor(h_in * sf_h))
        w_out = int(math.floor(w_in * sf_w))

    if h_out == h_in and w_out == w_in:
        return x
    if h_out % h_in == 0 and w_out % w_in == 0:
        return _upsample_int(x, h_out, w_out)
    return _upsample_general(x, h_out, w_out)


class Interpolate:
    """JAX/Pallas equivalent of the PyTorch Interpolate wrapper module."""

    def __init__(self, size=None, scale_factor=None, mode="nearest"):
        self.size = size
        self.scale_factor = scale_factor
        self.mode = mode

    def __call__(self, x):
        return interpolate_pallas(
            x, size=self.size, scale_factor=self.scale_factor, mode=self.mode
        )


if __name__ == "__main__":
    key = jax.random.PRNGKey(0)
    x = jax.random.normal(key, (2, 4, 16, 16), dtype=jnp.float32)

    # Fast path: integer scale factor (scale_factor=2, mode='nearest').
    module = Interpolate(scale_factor=2, mode="nearest")
    out = jax.block_until_ready(module(x))
    ref = jnp.repeat(jnp.repeat(x, 2, axis=2), 2, axis=3)
    assert out.shape == (2, 4, 32, 32), out.shape
    assert out.dtype == x.dtype
    np.testing.assert_allclose(np.asarray(out), np.asarray(ref),
                               rtol=1e-6, atol=1e-6)

    # General path: explicit non-multiple output size.
    out2 = jax.block_until_ready(Interpolate(size=(24, 24), mode="nearest")(x))
    h_idx = _nearest_index(24, 16)
    w_idx = _nearest_index(24, 16)
    ref2 = np.asarray(x)[:, :, h_idx, :][:, :, :, w_idx]
    assert out2.shape == (2, 4, 24, 24), out2.shape
    np.testing.assert_allclose(np.asarray(out2), ref2, rtol=1e-6, atol=1e-6)

    print("KERNEL_OK")
</pallas_src>

<mosaic_0001>
module attributes {stable_mosaic.version = 11 : i64} {
  func.func @_upsample_int_kernel(%arg0: i32, %arg1: memref<128x16xf32, #tpu.memory_space<vmem>>, %arg2: memref<16x64xf32, #tpu.memory_space<vmem>>, %arg3: memref<128x64xf32, #tpu.memory_space<vmem>>) attributes {dimension_semantics = [#tpu.dimension_semantics<parallel>], iteration_bounds = array<i64: 1>, scalar_prefetch = 0 : i64, scratch_operands = 0 : i64, tpu.core_type = #tpu.core_type<tc>, window_params = [{transform_indices = @transform_0, window_bounds = array<i64: 128, 16>}, {pipeline_mode = #tpu.pipeline_mode<synchronous>, transform_indices = @transform_1, window_bounds = array<i64: 16, 64>}, {transform_indices = @transform_2, window_bounds = array<i64: 128, 64>}]} {
    %c0 = arith.constant 0 : index
    %c0_0 = arith.constant 0 : index
    %0 = vector.load %arg1[%c0, %c0_0] : memref<128x16xf32, #tpu.memory_space<vmem>>, vector<128x16xf32>
    %c0_1 = arith.constant 0 : index
    %c0_2 = arith.constant 0 : index
    %1 = vector.load %arg2[%c0_1, %c0_2] : memref<16x64xf32, #tpu.memory_space<vmem>>, vector<16x64xf32>
    %cst = arith.constant dense<0.000000e+00> : vector<128x64xf32>
    %2 = tpu.matmul %0, %1, %cst {dimension_numbers = #tpu.dot_dimension_numbers<[1], [0], [0], [1], [0, 0, 1, 1], [], []>} : vector<128x16xf32>, vector<16x64xf32>, vector<128x64xf32> -> vector<128x64xf32>
    %c0_3 = arith.constant 0 : index
    %c0_4 = arith.constant 0 : index
    %3 = vector.load %arg3[%c0_3, %c0_4] : memref<128x64xf32, #tpu.memory_space<vmem>>, vector<128x64xf32>
    tpu.vector_store %arg3[%c0_3, %c0_4], %2 {strides = array<i32>} : memref<128x64xf32, #tpu.memory_space<vmem>>, vector<128x64xf32>,
    return
  }
  func.func @transform_0(%arg0: i32) -> (i32, i32) {
    %c0_i32 = arith.constant 0 : i32
    %c0_i32_0 = arith.constant 0 : i32
    return %arg0, %c0_i32 : i32, i32
  }
  func.func @transform_1(%arg0: i32) -> (i32, i32) {
    %c0_i32 = arith.constant 0 : i32
    %c0_i32_0 = arith.constant 0 : i32
    %c0_i32_1 = arith.constant 0 : i32
    return %c0_i32, %c0_i32_0 : i32, i32
  }
  func.func @transform_2(%arg0: i32) -> (i32, i32) {
    %c0_i32 = arith.constant 0 : i32
    %c0_i32_0 = arith.constant 0 : i32
    return %arg0, %c0_i32 : i32, i32
  }
}

</mosaic_0001>

<bundles_post_ra>
// kernel: interpolate_pallas.1
= control target key start
LH: loop header
LB: loop body
LE: loop exit
PB: predicated region body
PF: predicated region fallthrough
CT: control target
= control target key end

     0   :  { %7 = vsyncpa [#allocation3], 0  ;;  %s517_s0 = inlined_call_operand.hbm [shape: f32[128,16], index: 0, kind: input, shape index: {}]   ;;  %s518_s1 = inlined_call_operand.hbm [shape: f32[16,64], index: 1, kind: input, shape index: {}]   ;;  %s519_s2 = inlined_call_operand.vmem [shape: f32[128,64], index: 2, kind: output, shape index: {}]  }
   0x1   :  { %8 = vsyncpa [#allocation5], 0  ;;  %s394_s9 = smov [#allocation2]   ;;  %s346_s13 = scalar_lea.hbm %s517_s0, 2048 }
   0x2   :  { %s14_s10 = sshll.u32 %s394_s9, 4  ;;  %p347_p0 = scmp.ne.s32.totalorder %s517_s0, %s346_s13  ;;  %s15_s10 = int_to_ptr.vmem [resolvable:$true] %s14_s10 }
   0x3   :  { %p350_p1 = scmp.lt.u32.totalorder %s346_s13, %s517_s0 }
   0x5   :  { %p352_p2 = pnand %p350_p1, %p347_p0 }
   0x7   :  { %355 = shalt.err (!%p352_p2)
}
   0x8   :  { %s356_s18 = scalar_lea.vmem %s15_s10, 2048  ;;  %p361_p4 = scmp.lt.s32.totalorder %s15_s10, %s15_s10 }
   0x9   :  { %p357_p3 = scmp.ne.s32.totalorder %s15_s10, %s356_s18  ;;  %p362_p5 = scmp.lt.s32.totalorder %s356_s18, %s356_s18 }
   0xb   :  { %p363_p6 = por %p362_p5, %p361_p4 }
   0xd   :  { %p364_p7 = pnand %p363_p6, %p357_p3 }
   0xf   :  { %367 = shalt.err (!%p364_p7)
}
  0x10   :  { %s395_s19 = smov 128   ;;  %s396_s20 = smov 8  }
  0x11   :  { %20 = dma.hbm_to_vmem [thread:$0]  %s517_s0, 2048, %s15_s10, [#allocation3], %s395_s19, %s395_s19, %s396_s20  }
  0x12   :  { %s397_s23 = smov [#allocation4]   ;;  %s368_s27 = scalar_lea.hbm %s518_s1, 256 }
  0x13   :  { %s26_s24 = sshll.u32 %s397_s23, 4  ;;  %p369_p8 = scmp.ne.s32.totalorder %s518_s1, %s368_s27  ;;  %s27_s24 = int_to_ptr.vmem [resolvable:$true] %s26_s24 }
  0x14   :  { %p372_p9 = scmp.lt.u32.totalorder %s368_s27, %s518_s1 }
  0x16   :  { %p374_p10 = pnand %p372_p9, %p369_p8 }
  0x18   :  { %377 = shalt.err (!%p374_p10)
}
  0x19   :  { %s378_s4 = scalar_lea.vmem %s27_s24, 256  ;;  %p383_p12 = scmp.lt.s32.totalorder %s27_s24, %s27_s24 }
  0x1a   :  { %p379_p11 = scmp.ne.s32.totalorder %s27_s24, %s378_s4  ;;  %p384_p13 = scmp.lt.s32.totalorder %s378_s4, %s378_s4 }
  0x1c   :  { %p385_p0 = por %p384_p13, %p383_p12 }
  0x1e   :  { %p386_p1 = pnand %p385_p0, %p379_p11 }
  0x20   :  { %389 = shalt.err (!%p386_p1)
}
  0x21   :  { %32 = dma.hbm_to_vmem [thread:$0]  %s518_s1, 256, %s27_s24, [#allocation5], %s395_s19, %s395_s19, %s396_s20  }
  0x22   :  { %390 = dma.done.wait [#allocation3], 2048  }
  0x23   :  { %391 = vsyncadd [#allocation3], 4294965248 }
  0x24   :  { %392 = dma.done.wait [#allocation5], 256  }
  0x25   :  { %393 = vsyncadd [#allocation5], 4294967040  ;;  %vm57_vm0 = vcmask 130048   ;;  %v55_v0 = vld [vmem:[#allocation4] sm:$0xff]  ;;  %v56_v1 = vld [vmem:[#allocation4 + $0x8] sm:$0xff]  ;;  %vm251_vm1 = vcmask 523264  }
  0x26   :  { %v39_v2 = vld [vmem:[#allocation2] sm:$0xff]  ;;  %v336_v3 = vpack.c.bf16 %v56_v1, %v55_v0  ;;  %v40_v5 = vld [vmem:[#allocation2 + $0x8] sm:$0xff]  ;;  %v41_v7 = vld [vmem:[#allocation2 + $0x10] sm:$0xff] }
  0x27   :  { %312 = vmatprep.mubr.msk.f32.mxu0 %vm57_vm0, %v39_v2  ;;  %v47_v4 = vld [vmem:[#allocation2 + $0x40] sm:$0xff]  ;;  %v48_v6 = vld [vmem:[#allocation2 + $0x48] sm:$0xff]  ;;  %v49_v8 = vld [vmem:[#allocation2 + $0x50] sm:$0xff] }
  0x28   :  { %324 = vmatprep.mubr.msk.f32.mxu1 %vm57_vm0, %v47_v4  ;;  %337 = vmatprep.subr.bf16.mxu0 %v336_v3  ;;  %v42_v9 = vld [vmem:[#allocation2 + $0x18] sm:$0xff]  ;;  %v43_v11 = vld [vmem:[#allocation2 + $0x20] sm:$0xff]  ;;  %v44_v13 = vld [vmem:[#allocation2 + $0x28] sm:$0xff] }
  0x29   :  { %340 = vmatprep.subr.bf16.mxu1 %v336_v3  ;;  %339 = vmatpush3.bf16.msra.mxu0 %v336_v3  ;;  %v50_v10 = vld [vmem:[#allocation2 + $0x58] sm:$0xff]  ;;  %v51_v12 = vld [vmem:[#allocation2 + $0x60] sm:$0xff]  ;;  %v52_v14 = vld [vmem:[#allocation2 + $0x68] sm:$0xff] }
  0x2a   :  { %341 = vmatpush3.bf16.msra.mxu1 %v336_v3  ;;  %v45_v15 = vld [vmem:[#allocation2 + $0x30] sm:$0xff]  ;;  %v46_v17 = vld [vmem:[#allocation2 + $0x38] sm:$0xff] }
  0x2b   :  { %v53_v16 = vld [vmem:[#allocation2 + $0x70] sm:$0xff]  ;;  %v54_v18 = vld [vmem:[#allocation2 + $0x78] sm:$0xff] }
  0x2c   :  { %313 = vmatmul.mubr.msk.f32.vlgmr.msra.gmra.mrb[0].mxu0 %vm57_vm0, %v40_v5 }
  0x2d   :  { %325 = vmatmul.mubr.msk.f32.vlgmr.msra.gmra.mrb[0].mxu1 %vm57_vm0, %v48_v6  ;;  %315 = vmatprep.mubr.msk.f32.mxu0 %vm57_vm0, %v41_v7 }
  0x2e   :  { %327 = vmatprep.mubr.msk.f32.mxu1 %vm57_vm0, %v49_v8 }
  0x30   :  { %316 = vmatmul.mubr.msk.f32.gmra.mrb[2].mxu0 %vm57_vm0, %v42_v9 }
  0x31   :  { %328 = vmatmul.mubr.msk.f32.gmra.mrb[2].mxu1 %vm57_vm0, %v50_v10  ;;  %318 = vmatprep.mubr.msk.f32.mxu0 %vm57_vm0, %v43_v11 }
  0x32   :  { %330 = vmatprep.mubr.msk.f32.mxu1 %vm57_vm0, %v51_v12 }
  0x34   :  { %319 = vmatmul.mubr.msk.f32.gmra.mrb[4].mxu0 %vm57_vm0, %v44_v13 }
  0x35   :  { %331 = vmatmul.mubr.msk.f32.gmra.mrb[4].mxu1 %vm57_vm0, %v52_v14  ;;  %321 = vmatprep.mubr.msk.f32.mxu0 %vm57_vm0, %v45_v15 }
  0x36   :  { %333 = vmatprep.mubr.msk.f32.mxu1 %vm57_vm0, %v53_v16 }
  0x38   :  { %322 = vmatmul.mubr.msk.f32.gmra.mrb[6].mxu0 %vm57_vm0, %v46_v17 }
  0x39   :  { %334 = vmatmul.mubr.msk.f32.gmra.mrb[6].mxu1 %vm57_vm0, %v54_v18 }
  0xff   :  { %v314_v19 = vpop.f32.mrb[0].mxu0 }
 0x100   :  { %v326_v20 = vpop.f32.mrb[0].mxu1  ;;  %253 = vst.msk [vmem:[%s519_s2 + $0x8] sm:$0xff] %vm251_vm1, %v314_v19  ;;  %v172_v21 = vpop.f32.mrb[1].mxu0 }
 0x101   :  { %261 = vst.msk [vmem:[%s519_s2 + $0x48] sm:$0xff] %vm251_vm1, %v326_v20  ;;  %v212_v22 = vpop.f32.mrb[1].mxu1  ;;  %252 = vst.msk [vmem:[%s519_s2] sm:$0xff] %vm251_vm1, %v172_v21 }
 0x102   :  { %260 = vst.msk [vmem:[%s519_s2 + $0x40] sm:$0xff] %vm251_vm1, %v212_v22 }
 0x103   :  { %v317_v23 = vpop.f32.mrb[2].mxu0 }
 0x104   :  { %v329_v24 = vpop.f32.mrb[2].mxu1  ;;  %255 = vst.msk [vmem:[%s519_s2 + $0x18] sm:$0xff] %vm251_vm1, %v317_v23  ;;  %v182_v25 = vpop.f32.mrb[3].mxu0 }
 0x105   :  { %263 = vst.msk [vmem:[%s519_s2 + $0x58] sm:$0xff] %vm251_vm1, %v329_v24  ;;  %v222_v26 = vpop.f32.mrb[3].mxu1  ;;  %254 = vst.msk [vmem:[%s519_s2 + $0x10] sm:$0xff] %vm251_vm1, %v182_v25 }
 0x106   :  { %262 = vst.msk [vmem:[%s519_s2 + $0x50] sm:$0xff] %vm251_vm1, %v222_v26 }
 0x107   :  { %v320_v27 = vpop.f32.mrb[4].mxu0 }
 0x108   :  { %v332_v28 = vpop.f32.mrb[4].mxu1  ;;  %257 = vst.msk [vmem:[%s519_s2 + $0x28] sm:$0xff] %vm251_vm1, %v320_v27  ;;  %v192_v29 = vpop.f32.mrb[5].mxu0 }
 0x109   :  { %265 = vst.msk [vmem:[%s519_s2 + $0x68] sm:$0xff] %vm251_vm1, %v332_v28  ;;  %v232_v30 = vpop.f32.mrb[5].mxu1  ;;  %256 = vst.msk [vmem:[%s519_s2 + $0x20] sm:$0xff] %vm251_vm1, %v192_v29 }
 0x10a   :  { %264 = vst.msk [vmem:[%s519_s2 + $0x60] sm:$0xff] %vm251_vm1, %v232_v30 }
 0x10b   :  { %v323_v31 = vpop.f32.mrb[6].mxu0 }
 0x10c   :  { %v335_v32 = vpop.f32.mrb[6].mxu1  ;;  %259 = vst.msk [vmem:[%s519_s2 + $0x38] sm:$0xff] %vm251_vm1, %v323_v31  ;;  %v202_v33 = vpop.f32.mrb[7].mxu0 }
 0x10d   :  { %267 = vst.msk [vmem:[%s519_s2 + $0x78] sm:$0xff] %vm251_vm1, %v335_v32  ;;  %v242_v34 = vpop.f32.mrb[7].mxu1  ;;  %258 = vst.msk [vmem:[%s519_s2 + $0x30] sm:$0xff] %vm251_vm1, %v202_v33 }
 0x10e   :  { %266 = vst.msk [vmem:[%s519_s2 + $0x70] sm:$0xff] %vm251_vm1, %v242_v34 }
 0x10f   :  { %272 = vsyncpa [#allocation3], 1 }
 0x110   :  { %273 = vsyncpa [#allocation5], 1 }

</bundles_post_ra>
